<compile_context>
chip_gen: v6e
topology: v6e:2x2x1
jax: 0.10.0
libtpu: 0.0.40
codegen_flags: <defaults>
</compile_context>

<pallas_src>
import functools

import jax
import jax.numpy as jnp
from jax.experimental import pallas as pl
from jax.experimental.pallas import tpu as pltpu


# --------------------------------------------------------------------------- #
# Tiling helper: block dims must be divisible by (8, 128) or equal the full dim
# --------------------------------------------------------------------------- #
def _pick_tile(dim, pref, align):
    if dim % align != 0:
        return dim                      # must take the full (unaligned) extent
    t = min(dim, pref)
    t = max(align, (t // align) * align)
    while dim % t != 0:                 # keep the grid evenly divisible
        t -= align
    return t


# --------------------------------------------------------------------------- #
# Kernel 1: tiled dense  (X[M,K] @ W[K,N] + b, optional ReLU)
# --------------------------------------------------------------------------- #
def _dense_kernel(x_ref, w_ref, b_ref, o_ref, acc_ref, *, activation):
    @pl.when(pl.program_id(2) == 0)
    def _():
        acc_ref[...] = jnp.zeros_like(acc_ref)

    acc_ref[...] += jnp.dot(x_ref[...], w_ref[...],
                            preferred_element_type=jnp.float32)

    @pl.when(pl.program_id(2) == pl.num_programs(2) - 1)
    def _():
        out = acc_ref[...] + b_ref[...].astype(jnp.float32)
        if activation == "relu":
            out = jnp.maximum(out, 0.0)
        o_ref[...] = out.astype(o_ref.dtype)


def dense(x, w, b=None, activation=None, *, tm=256, tn=256, tk=512):
    M, K = x.shape
    K2, N = w.shape
    assert K == K2
    if b is None:
        b = jnp.zeros((N,), x.dtype)
    b2 = b.reshape(1, N)

    tm_ = _pick_tile(M, tm, 8)
    tn_ = _pick_tile(N, tn, 128)
    tk_ = _pick_tile(K, tk, 128)
    grid = (M // tm_, N // tn_, K // tk_)

    return pl.pallas_call(
        functools.partial(_dense_kernel, activation=activation),
        out_shape=jax.ShapeDtypeStruct((M, N), x.dtype),
        grid_spec=pltpu.PrefetchScalarGridSpec(
            num_scalar_prefetch=0,
            grid=grid,
            in_specs=[
                pl.BlockSpec((tm_, tk_), lambda i, j, k: (i, k)),
                pl.BlockSpec((tk_, tn_), lambda i, j, k: (k, j)),
                pl.BlockSpec((1, tn_), lambda i, j, k: (0, j)),
            ],
            out_specs=pl.BlockSpec((tm_, tn_), lambda i, j, k: (i, j)),
            scratch_shapes=[pltpu.VMEM((tm_, tn_), jnp.float32)],
        ),
        compiler_params=pltpu.CompilerParams(
            dimension_semantics=("parallel", "parallel", "arbitrary")),
    )(x, w, b2)


# --------------------------------------------------------------------------- #
# Kernel 2: scaled-dot-product attention per (batch*head, q-tile)
# --------------------------------------------------------------------------- #
def _attn_kernel(q_ref, k_ref, v_ref, o_ref, *, scale, causal):
    q = q_ref[0].astype(jnp.float32)            # (tq, Dh)
    k = k_ref[0].astype(jnp.float32)            # (Skv, Dh)
    v = v_ref[0].astype(jnp.float32)            # (Skv, Dh)

    s = jnp.dot(q, k.T, preferred_element_type=jnp.float32) * scale   # (tq, Skv)
    if causal:
        tq, skv = s.shape
        q_off = pl.program_id(1) * tq
        row = jax.lax.broadcasted_iota(jnp.int32, (tq, skv), 0) + q_off
        col = jax.lax.broadcasted_iota(jnp.int32, (tq, skv), 1)
        # dec_valid_lens = arange(1, S+1)  ->  key j valid iff j <= query index
        s = jnp.where(col <= row, s, jnp.float32(-1e6))

    m = jnp.max(s, axis=-1, keepdims=True)
    p = jnp.exp(s - m)
    p = p / jnp.sum(p, axis=-1, keepdims=True)
    # TODO(synk): attention-weight dropout (identity at rate 0.0)
    o = jnp.dot(p, v, preferred_element_type=jnp.float32)
    o_ref[0] = o.astype(o_ref.dtype)


def multihead_attention(q3, k3, v3, num_heads, causal):
    B, Sq, H = q3.shape
    Skv = k3.shape[1]
    Dh = H // num_heads

    def split_heads(x, S):
        return (x.reshape(B, S, num_heads, Dh)
                 .transpose(0, 2, 1, 3)
                 .reshape(B * num_heads, S, Dh))

    qh = split_heads(q3, Sq)
    kh = split_heads(k3, Skv)
    vh = split_heads(v3, Skv)

    tq = _pick_tile(Sq, 256, 8)
    grid = (B * num_heads, Sq // tq)

    out = pl.pallas_call(
        functools.partial(_attn_kernel, scale=1.0 / float(Dh) ** 0.5,
                          causal=causal),
        out_shape=jax.ShapeDtypeStruct((B * num_heads, Sq, Dh), q3.dtype),
        grid_spec=pltpu.PrefetchScalarGridSpec(
            num_scalar_prefetch=0,
            grid=grid,
            in_specs=[
                pl.BlockSpec((1, tq, Dh), lambda h, i: (h, i, 0)),
                pl.BlockSpec((1, Skv, Dh), lambda h, i: (h, 0, 0)),
                pl.BlockSpec((1, Skv, Dh), lambda h, i: (h, 0, 0)),
            ],
            out_specs=pl.BlockSpec((1, tq, Dh), lambda h, i: (h, i, 0)),
        ),
        compiler_params=pltpu.CompilerParams(
            dimension_semantics=("parallel", "parallel")),
    )(qh, kh, vh)

    return (out.reshape(B, num_heads, Sq, Dh)
               .transpose(0, 2, 1, 3)
               .reshape(B, Sq, H))


# --------------------------------------------------------------------------- #
# Kernel 3: fused residual add + LayerNorm over lane-dense [M, D] rows
# --------------------------------------------------------------------------- #
def _addnorm_kernel(x_ref, y_ref, g_ref, b_ref, o_ref, *, eps):
    # TODO(synk): dropout on the sublayer output (identity at rate 0.0)
    v = y_ref[...].astype(jnp.float32) + x_ref[...].astype(jnp.float32)
    mean = jnp.mean(v, axis=-1, keepdims=True)
    c = v - mean
    var = jnp.mean(c * c, axis=-1, keepdims=True)
    inv = jax.lax.rsqrt(var + eps)
    o = c * inv * g_ref[...].astype(jnp.float32) + b_ref[...].astype(jnp.float32)
    o_ref[...] = o.astype(o_ref.dtype)


def add_norm(x2, y2, gamma, beta, *, eps=1e-5, tm=512):
    M, D = x2.shape
    g2 = gamma.reshape(1, D)
    b2 = beta.reshape(1, D)
    tm_ = _pick_tile(M, tm, 8)
    grid = (M // tm_,)
    return pl.pallas_call(
        functools.partial(_addnorm_kernel, eps=eps),
        out_shape=jax.ShapeDtypeStruct((M, D), x2.dtype),
        grid_spec=pltpu.PrefetchScalarGridSpec(
            num_scalar_prefetch=0,
            grid=grid,
            in_specs=[
                pl.BlockSpec((tm_, D), lambda i: (i, 0)),
                pl.BlockSpec((tm_, D), lambda i: (i, 0)),
                pl.BlockSpec((1, D), lambda i: (0, 0)),
                pl.BlockSpec((1, D), lambda i: (0, 0)),
            ],
            out_specs=pl.BlockSpec((tm_, D), lambda i: (i, 0)),
        ),
        compiler_params=pltpu.CompilerParams(
            dimension_semantics=("parallel",)),
    )(x2, y2, g2, b2)


# --------------------------------------------------------------------------- #
# DecoderBlock forward (wrapper glue: head split/merge, KV-cache concat)
# --------------------------------------------------------------------------- #
def decoder_block_forward(X, state_i, params, num_heads, training=True):
    B, S, H = X.shape
    key_values = X if state_i is None else jnp.concatenate([state_i, X], axis=1)
    new_state_i = key_values
    Skv = key_values.shape[1]

    x2 = X.reshape(B * S, H)
    kv2 = key_values.reshape(B * Skv, H)

    q = dense(x2, params["Wq"]).reshape(B, S, H)
    k = dense(kv2, params["Wk"]).reshape(B, Skv, H)
    v = dense(kv2, params["Wv"]).reshape(B, Skv, H)

    attn = multihead_attention(q, k, v, num_heads, causal=training)
    attn2 = dense(attn.reshape(B * S, H), params["Wo"])

    y2 = add_norm(x2, attn2, params["ln1_g"], params["ln1_b"])

    h2 = dense(y2, params["W1"], params["b1"], activation="relu")
    f2 = dense(h2, params["W2"], params["b2"])

    out2 = add_norm(y2, f2, params["ln2_g"], params["ln2_b"])
    return out2.reshape(B, S, H), new_state_i


# --------------------------------------------------------------------------- #
# Pure-JAX reference (for correctness check)
# --------------------------------------------------------------------------- #
def ref_decoder_block(X, state_i, params, num_heads, training=True):
    B, S, H = X.shape
    key_values = X if state_i is None else jnp.concatenate([state_i, X], axis=1)
    Skv = key_values.shape[1]
    Dh = H // num_heads

    def split(x, L):
        return x.reshape(B, L, num_heads, Dh).transpose(0, 2, 1, 3)

    qh = split(X @ params["Wq"], S)
    kh = split(key_values @ params["Wk"], Skv)
    vh = split(key_values @ params["Wv"], Skv)

    s = jnp.einsum("bhqd,bhkd->bhqk", qh, kh) / jnp.sqrt(float(Dh))
    if training:
        row = jnp.arange(S)[:, None]
        col = jnp.arange(Skv)[None, :]
        s = jnp.where((col <= row)[None, None], s, -1e6)
    w = jax.nn.softmax(s, axis=-1)
    o = jnp.einsum("bhqk,bhkd->bhqd", w, vh)
    o = o.transpose(0, 2, 1, 3).reshape(B, S, H)
    attn = o @ params["Wo"]

    def layernorm(x, g, b):
        m = x.mean(-1, keepdims=True)
        var = ((x - m) ** 2).mean(-1, keepdims=True)
        return (x - m) / jnp.sqrt(var + 1e-5) * g + b

    Y = layernorm(X + attn, params["ln1_g"], params["ln1_b"])
    h = jax.nn.relu(Y @ params["W1"] + params["b1"])
    f = h @ params["W2"] + params["b2"]
    out = layernorm(Y + f, params["ln2_g"], params["ln2_b"])
    return out, key_values


# --------------------------------------------------------------------------- #
# Demo / self-check
# --------------------------------------------------------------------------- #
if __name__ == "__main__":
    B, S, H = 2, 8, 32
    NUM_HEADS = 4
    FFN_HIDDEN = 64

    key = jax.random.PRNGKey(0)
    ks = jax.random.split(key, 8)
    scale = 0.1
    params = {
        "Wq": scale * jax.random.normal(ks[0], (H, H), jnp.float32),
        "Wk": scale * jax.random.normal(ks[1], (H, H), jnp.float32),
        "Wv": scale * jax.random.normal(ks[2], (H, H), jnp.float32),
        "Wo": scale * jax.random.normal(ks[3], (H, H), jnp.float32),
        "ln1_g": jnp.ones((H,), jnp.float32),
        "ln1_b": jnp.zeros((H,), jnp.float32),
        "W1": scale * jax.random.normal(ks[4], (H, FFN_HIDDEN), jnp.float32),
        "b1": jnp.zeros((FFN_HIDDEN,), jnp.float32),
        "W2": scale * jax.random.normal(ks[5], (FFN_HIDDEN, H), jnp.float32),
        "b2": jnp.zeros((H,), jnp.float32),
        "ln2_g": jnp.ones((H,), jnp.float32),
        "ln2_b": jnp.zeros((H,), jnp.float32),
    }

    X = jax.random.normal(ks[6], (B, S, H), jnp.float32)

    # ---- training path: state[i] is None, causal masking ----
    out_train, state_i = decoder_block_forward(X, None, params, NUM_HEADS,
                                               training=True)
    out_train = jax.block_until_ready(out_train)
    ref_train, ref_state = ref_decoder_block(X, None, params, NUM_HEADS,
                                             training=True)
    assert jnp.allclose(out_train, ref_train, atol=1e-4, rtol=1e-4), \
        "training forward mismatch"
    assert jnp.allclose(state_i, ref_state), "state mismatch"

    # ---- inference path: one new step, state carries the KV cache ----
    X_step = jax.random.normal(ks[7], (B, 1, H), jnp.float32)
    out_eval, state_i2 = decoder_block_forward(X_step, state_i, params,
                                               NUM_HEADS, training=False)
    out_eval = jax.block_until_ready(out_eval)
    ref_eval, _ = ref_decoder_block(X_step, state_i, params, NUM_HEADS,
                                    training=False)
    assert jnp.allclose(out_eval, ref_eval, atol=1e-4, rtol=1e-4), \
        "inference forward mismatch"
    assert state_i2.shape == (B, S + 1, H), "state concat mismatch"

    print("KERNEL_OK")
</pallas_src>

<mosaic_0001>
module attributes {stable_mosaic.version = 11 : i64} {
  func.func @_dense_kernel(%arg0: i32, %arg1: i32, %arg2: i32, %arg3: memref<16x32xf32, #tpu.memory_space<vmem>>, %arg4: memref<32x32xf32, #tpu.memory_space<vmem>>, %arg5: memref<1x32xf32, #tpu.memory_space<vmem>>, %arg6: memref<16x32xf32, #tpu.memory_space<vmem>>, %arg7: memref<16x32xf32, #tpu.memory_space<vmem>>) attributes {dimension_semantics = [#tpu.dimension_semantics<parallel>, #tpu.dimension_semantics<parallel>, #tpu.dimension_semantics<arbitrary>], iteration_bounds = array<i64: 1, 1, 1>, scalar_prefetch = 0 : i64, scratch_operands = 1 : i64, tpu.core_type = #tpu.core_type<tc>, window_params = [{transform_indices = @transform_0, window_bounds = array<i64: 16, 32>}, {transform_indices = @transform_1, window_bounds = array<i64: 32, 32>}, {transform_indices = @transform_2, window_bounds = array<i64: 1, 32>}, {transform_indices = @transform_3, window_bounds = array<i64: 16, 32>}]} {
    %c0_i32 = arith.constant 0 : i32
    %0 = arith.cmpi eq, %arg2, %c0_i32 : i32
    %1 = arith.extui %0 : i1 to i32
    %c0_i32_0 = arith.constant 0 : i32
    %2 = arith.cmpi ne, %1, %c0_i32_0 : i32
    scf.if %2 {
      %cst_10 = arith.constant 0.000000e+00 : f32
      %12 = vector.broadcast %cst_10 : f32 to vector<16x32xf32>
      %c0_11 = arith.constant 0 : index
      %c0_12 = arith.constant 0 : index
      %13 = vector.load %arg7[%c0_11, %c0_12] : memref<16x32xf32, #tpu.memory_space<vmem>>, vector<16x32xf32>
      tpu.vector_store %arg7[%c0_11, %c0_12], %12 {strides = array<i32>} : memref<16x32xf32, #tpu.memory_space<vmem>>, vector<16x32xf32>,
    } else {
    }
    %c0 = arith.constant 0 : index
    %c0_1 = arith.constant 0 : index
    %3 = vector.load %arg7[%c0, %c0_1] : memref<16x32xf32, #tpu.memory_space<vmem>>, vector<16x32xf32>
    %c0_2 = arith.constant 0 : index
    %c0_3 = arith.constant 0 : index
    %4 = vector.load %arg3[%c0_2, %c0_3] : memref<16x32xf32, #tpu.memory_space<vmem>>, vector<16x32xf32>
    %c0_4 = arith.constant 0 : index
    %c0_5 = arith.constant 0 : index
    %5 = vector.load %arg4[%c0_4, %c0_5] : memref<32x32xf32, #tpu.memory_space<vmem>>, vector<32x32xf32>
    %cst = arith.constant dense<0.000000e+00> : vector<16x32xf32>
    %6 = tpu.matmul %4, %5, %cst {dimension_numbers = #tpu.dot_dimension_numbers<[1], [0], [0], [1], [0, 0, 1, 1], [], []>} : vector<16x32xf32>, vector<32x32xf32>, vector<16x32xf32> -> vector<16x32xf32>
    %7 = arith.addf %3, %6 : vector<16x32xf32>
    %c0_6 = arith.constant 0 : index
    %c0_7 = arith.constant 0 : index
    %8 = vector.load %arg7[%c0_6, %c0_7] : memref<16x32xf32, #tpu.memory_space<vmem>>, vector<16x32xf32>
    tpu.vector_store %arg7[%c0_6, %c0_7], %7 {strides = array<i32>} : memref<16x32xf32, #tpu.memory_space<vmem>>, vector<16x32xf32>,
    %c0_i32_8 = arith.constant 0 : i32
    %9 = arith.cmpi eq, %arg2, %c0_i32_8 : i32
    %10 = arith.extui %9 : i1 to i32
    %c0_i32_9 = arith.constant 0 : i32
    %11 = arith.cmpi ne, %10, %c0_i32_9 : i32
    scf.if %11 {
      %c0_10 = arith.constant 0 : index
      %c0_11 = arith.constant 0 : index
      %12 = vector.load %arg7[%c0_10, %c0_11] : memref<16x32xf32, #tpu.memory_space<vmem>>, vector<16x32xf32>
      %c0_12 = arith.constant 0 : index
      %c0_13 = arith.constant 0 : index
      %13 = vector.load %arg5[%c0_12, %c0_13] : memref<1x32xf32, #tpu.memory_space<vmem>>, vector<1x32xf32>
      %14 = vector.broadcast %13 : vector<1x32xf32> to vector<16x32xf32>
      %15 = arith.addf %12, %14 : vector<16x32xf32>
      %c0_14 = arith.constant 0 : index
      %c0_15 = arith.constant 0 : index
      %16 = vector.load %arg6[%c0_14, %c0_15] : memref<16x32xf32, #tpu.memory_space<vmem>>, vector<16x32xf32>
      tpu.vector_store %arg6[%c0_14, %c0_15], %15 {strides = array<i32>} : memref<16x32xf32, #tpu.memory_space<vmem>>, vector<16x32xf32>,
    } else {
    }
    return
  }
  func.func @transform_0(%arg0: i32, %arg1: i32, %arg2: i32) -> (i32, i32) {
    %c0_i32 = arith.constant 0 : i32
    return %arg0, %arg2 : i32, i32
  }
  func.func @transform_1(%arg0: i32, %arg1: i32, %arg2: i32) -> (i32, i32) {
    %c0_i32 = arith.constant 0 : i32
    return %arg2, %arg1 : i32, i32
  }
  func.func @transform_2(%arg0: i32, %arg1: i32, %arg2: i32) -> (i32, i32) {
    %c0_i32 = arith.constant 0 : i32
    %c0_i32_0 = arith.constant 0 : i32
    return %c0_i32, %arg1 : i32, i32
  }
  func.func @transform_3(%arg0: i32, %arg1: i32, %arg2: i32) -> (i32, i32) {
    %c0_i32 = arith.constant 0 : i32
    return %arg0, %arg1 : i32, i32
  }
}

</mosaic_0001>

<bundles_post_ra>
// kernel: tpu_custom_call.1
= control target key start
LH: loop header
LB: loop body
LE: loop exit
PB: predicated region body
PF: predicated region fallthrough
CT: control target
= control target key end

     0   :  { %8 = vsyncpa [#allocation4], 0  ;;  %s325_s0 = inlined_call_operand.hbm [shape: f32[16,32], index: 0, kind: input, shape index: {}]   ;;  %s326_s1 = inlined_call_operand.hbm [shape: f32[32,32], index: 1, kind: input, shape index: {}]   ;;  %s327_s2 = inlined_call_operand.vmem [shape: f32[1,32], index: 2, kind: input, shape index: {}]   ;;  %s328_s3 = inlined_call_operand.hbm [shape: f32[16,32], index: 3, kind: output, shape index: {}]  }
   0x1   :  { %9 = vsyncpa [#allocation7], 0 }
   0x2   :  { %10 = vsyncpa [#allocation5], 0  ;;  %s270_s12 = smov [#allocation3]  }
   0x3   :  { %s16_s13 = sshll.u32 %s270_s12, 4  ;;  %s17_s13 = int_to_ptr.vmem [resolvable:$true] %s16_s13 }
   0x4   :  { %s212_s14 = scalar_lea.vmem %s17_s13, 256  ;;  %p217_p1 = scmp.lt.s32.totalorder %s17_s13, %s17_s13 }
   0x5   :  { %p213_p0 = scmp.ne.s32.totalorder %s17_s13, %s212_s14  ;;  %p218_p2 = scmp.lt.s32.totalorder %s212_s14, %s212_s14 }
   0x7   :  { %p219_p3 = por %p218_p2, %p217_p1 }
   0x9   :  { %p220_p4 = pnand %p219_p3, %p213_p0 }
   0xb   :  { %223 = shalt.err (!%p220_p4)
}
   0xc   :  { %s271_s15 = smov 128   ;;  %s272_s16 = smov 8  }
   0xd   :  { %22 = dma.hbm_to_vmem [thread:$0]  %s325_s0, 256, %s17_s13, [#allocation4], %s271_s15, %s271_s15, %s272_s16  }
   0xe   :  { %s273_s19 = smov [#allocation6]  }
   0xf   :  { %s28_s20 = sshll.u32 %s273_s19, 4  ;;  %s29_s20 = int_to_ptr.vmem [resolvable:$true] %s28_s20 }
  0x10   :  { %s232_s21 = scalar_lea.vmem %s29_s20, 512  ;;  %p237_p6 = scmp.lt.s32.totalorder %s29_s20, %s29_s20 }
  0x11   :  { %p233_p5 = scmp.ne.s32.totalorder %s29_s20, %s232_s21  ;;  %p238_p7 = scmp.lt.s32.totalorder %s232_s21, %s232_s21 }
  0x13   :  { %p239_p8 = por %p238_p7, %p237_p6 }
  0x15   :  { %p240_p9 = pnand %p239_p8, %p233_p5 }
  0x17   :  { %243 = shalt.err (!%p240_p9)
}
  0x18   :  { %34 = dma.hbm_to_vmem [thread:$0]  %s326_s1, 512, %s29_s20, [#allocation7], %s271_s15, %s271_s15, %s272_s16  }
  0x19   :  { %264 = dma.done.wait [#allocation4], 256  }
  0x1a   :  { %265 = vsyncadd [#allocation4], 4294967040 }
  0x1b   :  { %266 = dma.done.wait [#allocation7], 512  }
  0x1c   :  { %267 = vsyncadd [#allocation7], 4294966784  ;;  %vm47_vm0 = vcmask 261120   ;;  %v274_v0 = vmov 0.0   ;;  %v57_v1 = vld [vmem:[#allocation6 + $0x18] sm:$0xff]  ;;  %v56_v2 = vld [vmem:[#allocation6 + $0x10] sm:$0xff] }
  0x1d   :  { %49 = vst.msk [vmem:[#allocation2 + $0x8] sm:$0xff] %vm47_vm0, %v274_v0  ;;  %48 = vst.msk [vmem:[#allocation2] sm:$0xff] %vm47_vm0, %v274_v0  ;;  %187 = vmatprep.subr.mxu0 %v57_v1  ;;  %v52_v3 = vld [vmem:[#allocation3] sm:$0xff]  ;;  %v55_v4 = vld [vmem:[#allocation6 + $0x8] sm:$0xff]  ;;  %s275_s24 = smov [#allocation8]  }
  0x1e   :  { %188 = vmatpush3.msra.mxu0 %v57_v1  ;;  %195 = vmatprep.mubr.msk.f32.mxu0 %vm47_vm0, %v52_v3  ;;  %v54_v5 = vld [vmem:[#allocation6] sm:$0xff]  ;;  %v53_v6 = vld [vmem:[#allocation3 + $0x8] sm:$0xff]  ;;  %s165_s25 = sshll.u32 %s275_s24, 4  ;;  %s166_s25 = int_to_ptr.vmem [resolvable:$true] %s165_s25 }
  0x1f   :  { %189 = vmatprep.subr.mxu0 %v56_v2  ;;  %v180_v13 = vld [vmem:[%s327_s2] ss:$0 sm:$0xff]  ;;  %s244_s26 = scalar_lea.vmem %s166_s25, 256  ;;  %p249_p11 = scmp.lt.s32.totalorder %s166_s25, %s166_s25 }
  0x20   :  { %190 = vmatpush3.msra.mxu0 %v56_v2  ;;  %p245_p10 = scmp.ne.s32.totalorder %s166_s25, %s244_s26  ;;  %p250_p12 = scmp.lt.s32.totalorder %s244_s26, %s244_s26 }
  0x21   :  { %191 = vmatprep.subr.mxu0 %v55_v4 }
  0x22   :  { %192 = vmatpush3.msra.mxu0 %v55_v4  ;;  %p251_p13 = por %p250_p12, %p249_p11 }
  0x23   :  { %193 = vmatprep.subr.mxu0 %v54_v5 }
  0x24   :  { %194 = vmatpush3.msra.mxu0 %v54_v5  ;;  %v51_v7 = vld [vmem:[#allocation2 + $0x8] sm:$0xff]  ;;  %v50_v9 = vld [vmem:[#allocation2] sm:$0xff]  ;;  %p252_p0 = pnand %p251_p13, %p245_p10 }
  0x25   :  { %196 = vmatmul.mubr.msk.f32.vlgmr.msra.gmra.mxu0 %vm47_vm0, %v53_v6 }
  0xe5   :  { %v197_v8 = vpop.f32.mrf.mxu0 }
  0xe6   :  { %v141_v10 = vadd.f32 %v197_v8, %v51_v7 }
  0xe7   :  { %v131_v11 = vpop.f32.mrf.mxu0 }
  0xe8   :  { %143 = vst.msk [vmem:[#allocation2 + $0x8] sm:$0xff] %vm47_vm0, %v141_v10  ;;  %v140_v12 = vadd.f32 %v131_v11, %v50_v9 }
  0xea   :  { %142 = vst.msk [vmem:[#allocation2] sm:$0xff] %vm47_vm0, %v140_v12 }
  0xef   :  { %v148_v14 = vld [vmem:[#allocation2 + $0x8] sm:$0xff] }
  0xf0   :  { %v157_v15 = vadd.f32 %v180_v13, %v148_v14 }
  0xf1   :  { %v147_v16 = vld [vmem:[#allocation2] sm:$0xff] }
  0xf2   :  { %v156_v17 = vadd.f32 %v180_v13, %v147_v16  ;;  %159 = vst.msk [vmem:[#allocation8 + $0x8] sm:$0xff] %vm47_vm0, %v157_v15 }
  0xf4   :  { %158 = vst.msk [vmem:[#allocation8] sm:$0xff] %vm47_vm0, %v156_v17 }
  0xf5   :  { %255 = shalt.err (!%p252_p0)
}
  0xf6   :  { %171 = dma.vmem_to_hbm [thread:$0]  %s166_s25, 256, %s328_s3, [#allocation5], %s271_s15, %s271_s15, %s272_s16  }
  0xf7   :  { %268 = dma.done.wait [#allocation5], 256  }
  0xf8   :  { %269 = vsyncadd [#allocation5], 4294967040 }
  0xf9   :  { %175 = vsyncpa [#allocation4], 1 }
  0xfa   :  { %176 = vsyncpa [#allocation7], 1 }
  0xfb   :  { %177 = vsyncpa [#allocation5], 1 }

</bundles_post_ra>
